<compile_context>
chip_gen: v7x
topology: tpu7x:2x2x1
jax: 0.10.0
libtpu: 0.0.40
codegen_flags: <defaults>
</compile_context>

<pallas_src>
import jax
import jax.numpy as jnp
import numpy as np
from jax.experimental import pallas as pl
from jax.experimental.pallas import tpu as pltpu


# ----------------------------- Pallas kernel ------------------------------ #
def _kernelnet_kernel(x_ref, w1_ref, b1_ref, w2_ref, b2_ref, w3_ref, b3_ref,
                      o_ref):
    # x_ref: (Cin=1, TM) -- one lane-dense tile of positions.
    x = x_ref[...]                                   # (1, TM) f32

    # layer 1: Linear1d(1 -> H) * omega_0 (folded), then Sine.
    # K=1 contraction -> broadcast FMA on the VPU instead of an MXU matmul.
    h = w1_ref[...] * x + b1_ref[...]                # (H,1)*(1,TM)+(H,1) -> (H,TM)
    h = jnp.sin(h)

    # layer 2: Linear1d(H -> H) * omega_0 (folded), then Sine.  MXU matmul with
    # the wide TM axis as the N dimension.
    h = jnp.dot(w2_ref[...], h, preferred_element_type=jnp.float32) + b2_ref[...]
    h = jnp.sin(h)

    # layer 3: Linear1d(H -> Cout).
    o_ref[...] = (jnp.dot(w3_ref[...], h, preferred_element_type=jnp.float32)
                  + b3_ref[...]).astype(o_ref.dtype)


def kernelnet_forward(x_ncl, kparams, *, tm=1024):
    """x_ncl: (B, Cin, L) float32.  kparams: channel-major, omega_0-folded
    parameters from init_kernelnet_params().  Returns (B, Cout, L)."""
    w1, b1, w2, b2, w3, b3 = kparams
    B, Cin, L = x_ncl.shape
    H = w2.shape[0]
    Cout = w3.shape[0]

    # (B, Cin, L) -> (Cin, B*L): channels on sublanes, positions on lanes.
    N = B * L
    x_cn = jnp.transpose(x_ncl, (1, 0, 2)).reshape(Cin, N)

    # Pick an effective tile: a multiple of 128, no bigger than the padded data.
    tm_eff = min(tm, pl.cdiv(N, 128) * 128)
    n_pad = pl.cdiv(N, tm_eff) * tm_eff
    if n_pad != N:
        x_cn = jnp.pad(x_cn, ((0, 0), (0, n_pad - N)))

    rep = lambda i: (0, 0)   # weights/biases: single resident block
    out = pl.pallas_call(
        _kernelnet_kernel,
        out_shape=jax.ShapeDtypeStruct((Cout, n_pad), jnp.float32),
        grid_spec=pltpu.PrefetchScalarGridSpec(
            num_scalar_prefetch=0,
            grid=(n_pad // tm_eff,),
            in_specs=[
                pl.BlockSpec((Cin, tm_eff), lambda i: (0, i)),   # x tile
                pl.BlockSpec((H, Cin), rep),                     # W1 * omega_0
                pl.BlockSpec((H, 1), rep),                       # b1 * omega_0
                pl.BlockSpec((H, H), rep),                       # W2 * omega_0
                pl.BlockSpec((H, 1), rep),                       # b2 * omega_0
                pl.BlockSpec((Cout, H), rep),                    # W3
                pl.BlockSpec((Cout, 1), rep),                    # b3
            ],
            out_specs=pl.BlockSpec((Cout, tm_eff), lambda i: (0, i)),
        ),
        compiler_params=pltpu.CompilerParams(
            dimension_semantics=("parallel",)),   # shards grid across v7x TCs
    )(x_cn, w1, b1, w2, b2, w3, b3)

    # (Cout, n_pad) -> (Cout, B*L) -> (B, Cout, L)
    out = out[:, :N]
    return jnp.transpose(out.reshape(Cout, B, L), (1, 0, 2))


# ------------------------- parameter construction -------------------------- #
def _weight_norm(v, g):
    """PyTorch weight_norm (dim=0): W[o,:] = g[o] * v[o,:] / ||v[o,:]||."""
    norm = jnp.sqrt(jnp.sum(v * v, axis=1, keepdims=True))
    return g * v / norm


def init_kernelnet_params(key, hidden_channels, out_channels, omega_0):
    """Deterministic init mirroring KernelNet.initialize():
       layer-1 v ~ U(-1,1); later layers v ~ U(-sqrt(6/in)/w0, +sqrt(6/in)/w0);
       biases ~ U(-1,1); weight-norm gain g = ||v|| (its value at wrap time).

    Returns (raw_params, kernel_params):
      raw_params:    (w1,b1,w2,b2,w3,b3) in PyTorch (out,in) layout, unscaled.
      kernel_params: channel-major, with omega_0 folded into layers 1 and 2,
                     biases as (C, 1) columns for lane broadcast.
    """
    H, Cout = hidden_channels, out_channels
    ks = jax.random.split(key, 6)

    v1 = jax.random.uniform(ks[0], (H, 1), jnp.float32, -1.0, 1.0)
    b1 = jax.random.uniform(ks[1], (H,), jnp.float32, -1.0, 1.0)

    lim2 = np.sqrt(6.0 / H) / omega_0
    v2 = jax.random.uniform(ks[2], (H, H), jnp.float32, -lim2, lim2)
    b2 = jax.random.uniform(ks[3], (H,), jnp.float32, -1.0, 1.0)

    lim3 = np.sqrt(6.0 / H) / omega_0
    v3 = jax.random.uniform(ks[4], (Cout, H), jnp.float32, -lim3, lim3)
    b3 = jax.random.uniform(ks[5], (Cout,), jnp.float32, -1.0, 1.0)

    g1 = jnp.sqrt(jnp.sum(v1 * v1, axis=1, keepdims=True))
    g2 = jnp.sqrt(jnp.sum(v2 * v2, axis=1, keepdims=True))
    g3 = jnp.sqrt(jnp.sum(v3 * v3, axis=1, keepdims=True))

    w1 = _weight_norm(v1, g1)   # (H, 1)
    w2 = _weight_norm(v2, g2)   # (H, H)
    w3 = _weight_norm(v3, g3)   # (Cout, H)

    raw = (w1, b1, w2, b2, w3, b3)
    kparams = (
        (omega_0 * w1).astype(jnp.float32),                 # (H, Cin)
        (omega_0 * b1).reshape(H, 1).astype(jnp.float32),   # (H, 1)
        (omega_0 * w2).astype(jnp.float32),                 # (H, H)
        (omega_0 * b2).reshape(H, 1).astype(jnp.float32),   # (H, 1)
        w3.astype(jnp.float32),                             # (Cout, H)
        b3.reshape(Cout, 1).astype(jnp.float32),            # (Cout, 1)
    )
    return raw, kparams


# ----------------------------- reference (JAX) ----------------------------- #
def kernelnet_reference(x_ncl, raw_params, omega_0):
    w1, b1, w2, b2, w3, b3 = raw_params
    B, Cin, L = x_ncl.shape
    x = jnp.transpose(x_ncl, (0, 2, 1)).reshape(B * L, Cin)
    h = jnp.sin(omega_0 * (x @ w1.T + b1))
    h = jnp.sin(omega_0 * (h @ w2.T + b2))
    y = h @ w3.T + b3
    return jnp.transpose(y.reshape(B, L, -1), (0, 2, 1))


if __name__ == "__main__":
    B, Cin, L = 2, 1, 16          # Conv1d (NCL) input: (batch, 1, seq)
    hidden_channels = 32
    out_channels = 8              # e.g. Nin * Nout of the generated conv kernel
    omega_0 = 30.0

    key = jax.random.PRNGKey(0)
    k_x, k_p = jax.random.split(key)

    # Relative-position-style input coordinates in [-1, 1].
    x = jax.random.uniform(k_x, (B, Cin, L), jnp.float32, -1.0, 1.0)
    raw_params, kparams = init_kernelnet_params(
        k_p, hidden_channels, out_channels, omega_0)

    out = kernelnet_forward(x, kparams, tm=1024)
    out = jax.block_until_ready(out)

    ref = kernelnet_reference(x, raw_params, omega_0)
    assert out.shape == (B, out_channels, L)
    np.testing.assert_allclose(np.asarray(out), np.asarray(ref),
                               rtol=2e-5, atol=2e-5)
    print("KERNEL_OK")
</pallas_src>

<mosaic_0001>
module attributes {stable_mosaic.version = 11 : i64} {
  func.func @_kernelnet_kernel(%arg0: i32, %arg1: memref<1x128xf32, #tpu.memory_space<vmem>>, %arg2: memref<32x1xf32, #tpu.memory_space<vmem>>, %arg3: memref<32x1xf32, #tpu.memory_space<vmem>>, %arg4: memref<32x32xf32, #tpu.memory_space<vmem>>, %arg5: memref<32x1xf32, #tpu.memory_space<vmem>>, %arg6: memref<8x32xf32, #tpu.memory_space<vmem>>, %arg7: memref<8x1xf32, #tpu.memory_space<vmem>>, %arg8: memref<8x128xf32, #tpu.memory_space<vmem>>) attributes {dimension_semantics = [#tpu.dimension_semantics<parallel>], iteration_bounds = array<i64: 1>, scalar_prefetch = 0 : i64, scratch_operands = 0 : i64, tpu.core_type = #tpu.core_type<tc>, window_params = [{transform_indices = @transform_0, window_bounds = array<i64: 1, 128>}, {pipeline_mode = #tpu.pipeline_mode<synchronous>, transform_indices = @transform_1, window_bounds = array<i64: 32, 1>}, {pipeline_mode = #tpu.pipeline_mode<synchronous>, transform_indices = @transform_2, window_bounds = array<i64: 32, 1>}, {pipeline_mode = #tpu.pipeline_mode<synchronous>, transform_indices = @transform_3, window_bounds = array<i64: 32, 32>}, {pipeline_mode = #tpu.pipeline_mode<synchronous>, transform_indices = @transform_4, window_bounds = array<i64: 32, 1>}, {pipeline_mode = #tpu.pipeline_mode<synchronous>, transform_indices = @transform_5, window_bounds = array<i64: 8, 32>}, {pipeline_mode = #tpu.pipeline_mode<synchronous>, transform_indices = @transform_6, window_bounds = array<i64: 8, 1>}, {transform_indices = @transform_7, window_bounds = array<i64: 8, 128>}]} {
    %c0 = arith.constant 0 : index
    %c0_0 = arith.constant 0 : index
    %0 = vector.load %arg1[%c0, %c0_0] : memref<1x128xf32, #tpu.memory_space<vmem>>, vector<1x128xf32>
    %c0_1 = arith.constant 0 : index
    %c0_2 = arith.constant 0 : index
    %1 = vector.load %arg2[%c0_1, %c0_2] : memref<32x1xf32, #tpu.memory_space<vmem>>, vector<32x1xf32>
    %2 = vector.broadcast %1 : vector<32x1xf32> to vector<32x128xf32>
    %3 = vector.broadcast %0 : vector<1x128xf32> to vector<32x128xf32>
    %4 = arith.mulf %2, %3 : vector<32x128xf32>
    %c0_3 = arith.constant 0 : index
    %c0_4 = arith.constant 0 : index
    %5 = vector.load %arg3[%c0_3, %c0_4] : memref<32x1xf32, #tpu.memory_space<vmem>>, vector<32x1xf32>
    %6 = vector.broadcast %5 : vector<32x1xf32> to vector<32x128xf32>
    %7 = arith.addf %4, %6 : vector<32x128xf32>
    %8 = math.sin %7 : vector<32x128xf32>
    %c0_5 = arith.constant 0 : index
    %c0_6 = arith.constant 0 : index
    %9 = vector.load %arg4[%c0_5, %c0_6] : memref<32x32xf32, #tpu.memory_space<vmem>>, vector<32x32xf32>
    %cst = arith.constant dense<0.000000e+00> : vector<32x128xf32>
    %10 = tpu.matmul %9, %8, %cst {dimension_numbers = #tpu.dot_dimension_numbers<[1], [0], [0], [1], [0, 0, 1, 1], [], []>} : vector<32x32xf32>, vector<32x128xf32>, vector<32x128xf32> -> vector<32x128xf32>
    %c0_7 = arith.constant 0 : index
    %c0_8 = arith.constant 0 : index
    %11 = vector.load %arg5[%c0_7, %c0_8] : memref<32x1xf32, #tpu.memory_space<vmem>>, vector<32x1xf32>
    %12 = vector.broadcast %11 : vector<32x1xf32> to vector<32x128xf32>
    %13 = arith.addf %10, %12 : vector<32x128xf32>
    %14 = math.sin %13 : vector<32x128xf32>
    %c0_9 = arith.constant 0 : index
    %c0_10 = arith.constant 0 : index
    %15 = vector.load %arg6[%c0_9, %c0_10] : memref<8x32xf32, #tpu.memory_space<vmem>>, vector<8x32xf32>
    %cst_11 = arith.constant dense<0.000000e+00> : vector<8x128xf32>
    %16 = tpu.matmul %15, %14, %cst_11 {dimension_numbers = #tpu.dot_dimension_numbers<[1], [0], [0], [1], [0, 0, 1, 1], [], []>} : vector<8x32xf32>, vector<32x128xf32>, vector<8x128xf32> -> vector<8x128xf32>
    %c0_12 = arith.constant 0 : index
    %c0_13 = arith.constant 0 : index
    %17 = vector.load %arg7[%c0_12, %c0_13] : memref<8x1xf32, #tpu.memory_space<vmem>>, vector<8x1xf32>
    %18 = vector.broadcast %17 : vector<8x1xf32> to vector<8x128xf32>
    %19 = arith.addf %16, %18 : vector<8x128xf32>
    %c0_14 = arith.constant 0 : index
    %c0_15 = arith.constant 0 : index
    %20 = vector.load %arg8[%c0_14, %c0_15] : memref<8x128xf32, #tpu.memory_space<vmem>>, vector<8x128xf32>
    tpu.vector_store %arg8[%c0_14, %c0_15], %19 {strides = array<i32>} : memref<8x128xf32, #tpu.memory_space<vmem>>, vector<8x128xf32>,
    return
  }
  func.func @transform_0(%arg0: i32) -> (i32, i32) {
    %c0_i32 = arith.constant 0 : i32
    %c0_i32_0 = arith.constant 0 : i32
    return %c0_i32, %arg0 : i32, i32
  }
  func.func @transform_1(%arg0: i32) -> (i32, i32) {
    %c0_i32 = arith.constant 0 : i32
    %c0_i32_0 = arith.constant 0 : i32
    %c0_i32_1 = arith.constant 0 : i32
    return %c0_i32, %c0_i32_0 : i32, i32
  }
  func.func @transform_2(%arg0: i32) -> (i32, i32) {
    %c0_i32 = arith.constant 0 : i32
    %c0_i32_0 = arith.constant 0 : i32
    %c0_i32_1 = arith.constant 0 : i32
    return %c0_i32, %c0_i32_0 : i32, i32
  }
  func.func @transform_3(%arg0: i32) -> (i32, i32) {
    %c0_i32 = arith.constant 0 : i32
    %c0_i32_0 = arith.constant 0 : i32
    %c0_i32_1 = arith.constant 0 : i32
    return %c0_i32, %c0_i32_0 : i32, i32
  }
  func.func @transform_4(%arg0: i32) -> (i32, i32) {
    %c0_i32 = arith.constant 0 : i32
    %c0_i32_0 = arith.constant 0 : i32
    %c0_i32_1 = arith.constant 0 : i32
    return %c0_i32, %c0_i32_0 : i32, i32
  }
  func.func @transform_5(%arg0: i32) -> (i32, i32) {
    %c0_i32 = arith.constant 0 : i32
    %c0_i32_0 = arith.constant 0 : i32
    %c0_i32_1 = arith.constant 0 : i32
    return %c0_i32, %c0_i32_0 : i32, i32
  }
  func.func @transform_6(%arg0: i32) -> (i32, i32) {
    %c0_i32 = arith.constant 0 : i32
    %c0_i32_0 = arith.constant 0 : i32
    %c0_i32_1 = arith.constant 0 : i32
    return %c0_i32, %c0_i32_0 : i32, i32
  }
  func.func @transform_7(%arg0: i32) -> (i32, i32) {
    %c0_i32 = arith.constant 0 : i32
    %c0_i32_0 = arith.constant 0 : i32
    return %c0_i32, %arg0 : i32, i32
  }
}

</mosaic_0001>

<bundles_post_ra>
// kernel: tpu_custom_call.1
= control target key start
LH: loop header
LB: loop body
LE: loop exit
PB: predicated region body
PF: predicated region fallthrough
CT: control target
= control target key end

     0   :  { %v1334_v2 = vmov 0   ;;  %s2105_s0 = inlined_call_operand.vmem [shape: f32[1,128], index: 0, kind: input, shape index: {}]   ;;  %s2106_s1 = inlined_call_operand.vmem [shape: f32[32,1], index: 1, kind: input, shape index: {}]   ;;  %s2107_s2 = inlined_call_operand.vmem [shape: f32[32,1], index: 2, kind: input, shape index: {}]   ;;  %s2108_s3 = inlined_call_operand.vmem [shape: f32[32,32], index: 3, kind: input, shape index: {}]   ;;  %s2109_s4 = inlined_call_operand.vmem [shape: f32[32,1], index: 4, kind: input, shape index: {}]   ;;  %s2110_s5 = inlined_call_operand.vmem [shape: f32[8,32], index: 5, kind: input, shape index: {}]   ;;  %s2111_s6 = inlined_call_operand.vmem [shape: f32[8,1], index: 6, kind: input, shape index: {}]   ;;  %s2112_s7 = inlined_call_operand.hbm [shape: f32[8,128], index: 7, kind: output, shape index: {}]  }
   0x1   :  { %v62_v0 = vld [vmem:[%s2107_s2] sm:$0xff]  ;;  %1277 = vset.pattern.permute.xlu1 %v1334_v2  ;;  %1276 = vset.pattern.permute.xlu0 %v1334_v2  ;;  %v63_v3 = vld [vmem:[%s2107_s2 + $0x8] sm:$0xff] }
   0x2   :  { %v28_v1 = vld [vmem:[%s2106_s1] sm:$0xff]  ;;  %68 = vperm.xlu1 %1277, %v62_v0   ;;  %v29_v4 = vld [vmem:[%s2106_s1 + $0x8] sm:$0xff] }
   0x3   :  { %34 = vperm.xlu0 %1276, %v28_v1  }
   0x4   :  { %12 = vsyncpa [#allocation3], 0  ;;  %v31_v5 = vld [vmem:[%s2106_s1 + $0x18] sm:$0xff]  ;;  %v30_v6 = vld [vmem:[%s2106_s1 + $0x10] sm:$0xff]  ;;  %v1335_v48 = vmov 920167782  }
   0x5   :  { %v65_v7 = vld [vmem:[%s2107_s2 + $0x18] sm:$0xff]  ;;  %v64_v8 = vld [vmem:[%s2107_s2 + $0x10] sm:$0xff]  ;;  %v511_v9 = vld [vmem:[%s2109_s4 + $0x8] sm:$0xff]  ;;  %v1336_v56 = vmov 2102212464   ;;  %s1344_s10 = smov [#allocation2]  }
   0x6   :  { %73 = vperm.xlu1 %1277, %v63_v3   ;;  %v510_v10 = vld [vmem:[%s2109_s4] sm:$0xff]  ;;  %v513_v11 = vld [vmem:[%s2109_s4 + $0x18] sm:$0xff]  ;;  %v512_v12 = vld [vmem:[%s2109_s4 + $0x10] sm:$0xff]  ;;  %v1337_v58 = vmov 1326507024   ;;  %s1135_s11 = sshll.u32 %s1344_s10, 4  ;;  %s1136_s11 = int_to_ptr.vmem [resolvable:$true] %s1135_s11 }
   0x7   :  { %39 = vperm.xlu0 %1276, %v29_v4   ;;  %v1049_v13 = vld [vmem:[%s2111_s6] sm:$0xff]  ;;  %s1310_s12 = scalar_lea.vmem %s1136_s11, 128  ;;  %p1315_p1 = scmp.lt.s32.totalorder %s1136_s11, %s1136_s11 }
   0x8   :  { %v1143_v14 = vld [vmem:[%s2105_s0] ss:$0 sm:$0xff]  ;;  %p1311_p0 = scmp.ne.s32.totalorder %s1136_s11, %s1310_s12  ;;  %p1316_p2 = scmp.lt.s32.totalorder %s1310_s12, %s1310_s12 }
   0xa   :  { %49 = vperm.xlu1 %1277, %v31_v5   ;;  %p1317_p3 = por %p1316_p2, %p1315_p1 }
   0xb   :  { %44 = vperm.xlu0 %1276, %v30_v6  }
   0xc   :  { %p1318_p4 = pnand %p1317_p3, %p1311_p0 }
   0xe   :  { %83 = vperm.xlu1 %1277, %v65_v7  }
   0xf   :  { %78 = vperm.xlu0 %1276, %v64_v8  }
  0x12   :  { %521 = vperm.xlu1 %1277, %v511_v9  }
  0x13   :  { %516 = vperm.xlu0 %1276, %v510_v10  }
  0x16   :  { %531 = vperm.xlu1 %1277, %v513_v11  }
  0x17   :  { %526 = vperm.xlu0 %1276, %v512_v12  }
  0x1b   :  { %1052 = vperm.xlu0 %1276, %v1049_v13  }
  0x81   :  { %v69_v15 = vpop.permute.xlu1 %68 }
  0x82   :  { %v35_v16 = vpop.permute.xlu0 %34 }
  0x83   :  { %v58_v17 = vmul.f32 %v1143_v14, %v35_v16 }
  0x85   :  { %v1427_v18 = vadd.f32 %v69_v15, %v58_v17  ;;  %v74_v19 = vpop.permute.xlu1 %73 }
  0x86   :  { %v40_v20 = vpop.permute.xlu0 %39 }
  0x87   :  { %v93_v21 = vand.u32 2139095040, %v1427_v18  ;;  %v59_v22 = vmul.f32 %v1143_v14, %v40_v20  ;;  %v90_v29 = vand.u32 2147483647, %v1427_v18  ;;  %v1338_v20 = vmov 683565275  }
  0x89   :  { %v94_v23 = vshrl.u32 %v93_v21, 23  ;;  %v1430_v24 = vadd.f32 %v74_v19, %v59_v22  ;;  %v50_v25 = vpop.permute.xlu1 %49  ;;  %v97_v42 = vand.u32 8388607, %v90_v29  ;;  %v1339_v22 = vmov 2475754826  }
  0x8a   :  { %v45_v26 = vpop.permute.xlu0 %44  ;;  %v61_v32 = vmul.f32 %v1143_v14, %v50_v25 }
  0x8b   :  { %v1144_v27 = vadd.s32 4294967169, %v94_v23  ;;  %v197_v28 = vand.u32 2139095040, %v1430_v24  ;;  %v60_v33 = vmul.f32 %v1143_v14, %v45_v26  ;;  %v98_v51 = vor.u32 8388608, %v97_v42 }
  0x8c   :  { %v194_v55 = vand.u32 2147483647, %v1430_v24 }
  0x8d   :  { %v100_v30 = vadd.s32 1, %v1144_v27  ;;  %v198_v31 = vshrl.u32 %v197_v28, 23  ;;  %v84_v34 = vpop.permute.xlu1 %83  ;;  %v1472_v2 = vshll.u32 %v98_v51, 8 }
  0x8e   :  { %v79_v35 = vpop.permute.xlu0 %78  ;;  %v1434_v37 = vadd.f32 %v84_v34, %v61_v32  ;;  %v1476_v6 = vand.u32 8388607, %v194_v55 }
  0x8f   :  { %vm101_vm0 = vcmp.gt.s32.totalorder %v100_v30, 0  ;;  %v1148_v36 = vadd.s32 4294967169, %v198_v31  ;;  %v1436_v38 = vadd.f32 %v79_v35, %v60_v33 }
  0x90   :  { %v102_v39 = vsel %vm101_vm0, %v100_v30, 0  ;;  %v402_v43 = vand.u32 2147483647, %v1434_v37  ;;  %v405_v44 = vand.u32 2139095040, %v1434_v37  ;;  %v1340_v30 = vmov 2131351028  }
  0x91   :  { %v1438_v40 = vand.u32 31, %v102_v39  ;;  %v204_v41 = vadd.s32 1, %v1148_v36  ;;  %v298_v46 = vand.u32 2147483647, %v1436_v38  ;;  %v1450_v52 = vshrl.u32 %v102_v39, 5 }
  0x92   :  { %v406_v47 = vshrl.u32 %v405_v44, 23  ;;  %v409_v54 = vand.u32 8388607, %v402_v43  ;;  %v301_v60 = vand.u32 2139095040, %v1436_v38 }
  0x93   :  { %v1445_v45 = vsub.s32 32, %v1438_v40  ;;  %vm205_vm1 = vcmp.gt.s32.totalorder %v204_v41, 0  ;;  %v116_v57 = vshll.u32 %v1336_v56, %v1438_v40  ;;  %v305_v61 = vand.u32 8388607, %v298_v46 }
  0x94   :  { %v206_v50 = vsel %vm205_vm1, %v204_v41, 0  ;;  %v1156_v53 = vadd.s32 4294967169, %v406_v47  ;;  %v1470_v0 = vshll.u32 %v1335_v48, %v1438_v40  ;;  %v410_v3 = vor.u32 8388608, %v409_v54 }
  0x95   :  { %v117_v49 = vshrl.u32 %v1335_v48, %v1445_v45  ;;  %v1459_v59 = vshrl.u32 %v1337_v58, %v1445_v45  ;;  %v1464_v62 = vand.u32 31, %v206_v50  ;;  %v302_v4 = vshrl.u32 %v301_v60, 23 }
  0x96   :  { %v412_v1 = vadd.s32 1, %v1156_v53  ;;  %v306_v5 = vor.u32 8388608, %v305_v61  ;;  %vm125_vm2 = vcmp.lt.s32.totalorder %v1450_v52, 4  ;;  %v1481_v8 = vshrl.u32 %v206_v50, 5 }
  0x97   :  { %v1466_v63 = vor.u32 %v117_v49, %v116_v57  ;;  %v121_v7 = vor.u32 %v1459_v59, %v1470_v0  ;;  %v1484_v9 = vsub.s32 32, %v1464_v62  ;;  %v1488_v10 = vshll.u32 %v1336_v56, %v1464_v62 }
  0x98   :  { %vm413_vm3 = vcmp.gt.s32.totalorder %v412_v1, 0  ;;  %v1152_v12 = vadd.s32 4294967169, %v302_v4  ;;  %v1497_v14 = vshll.u32 %v1335_v48, %v1464_v62  ;;  %v1499_v17 = vshll.u32 %v410_v3, 8 }
  0x99   :  { %v414_v11 = vsel %vm413_vm3, %v412_v1, 0  ;;  %v1493_v13 = vsel %vm125_vm2, %v1466_v63, 920167782  ;;  %v1501_v19 = vshll.u32 %v306_v5, 8  ;;  %v107_v21 = vshll.u32 %v1338_v20, %v1438_v40 }
  0x9a   :  { %v415_v15 = vshrl.u32 %v414_v11, 5  ;;  %v416_v16 = vand.u32 31, %v414_v11  ;;  %v108_v23 = vshrl.u32 %v1339_v22, %v1445_v45  ;;  %v308_v28 = vadd.s32 1, %v1152_v12 }
  0x9b   :  { %vm122_vm14 = vcmp.lt.s32.totalorder %v1450_v52, 1  ;;  %vm123_vm15 = vcmp.lt.s32.totalorder %v1450_v52, 2  ;;  %vm124_vm0 = vcmp.lt.s32.totalorder %v1450_v52, 3  ;;  %v214_v52 = vshll.u32 %v1339_v22, %v1464_v62 }
  0x9c   :  { %v417_v25 = vsub.s32 32, %v416_v16  ;;  %v419_v26 = vshll.u32 %v1338_v20, %v416_v16  ;;  %v422_v27 = vshll.u32 %v1339_v22, %v416_v16  ;;  %v425_v31 = vshll.u32 %v1340_v30, %v416_v16 }
  0x9d   :  { %v428_v32 = vshll.u32 %v1336_v56, %v416_v16  ;;  %v431_v33 = vshll.u32 %v1335_v48, %v416_v16  ;;  %vm434_vm4 = vcmp.lt.s32.totalorder %v415_v15, 1  ;;  %vm435_vm5 = vcmp.lt.s32.totalorder %v415_v15, 2 }
  0x9e   :  { %v420_v34 = vshrl.u32 %v1339_v22, %v417_v25  ;;  %v423_v35 = vshrl.u32 %v1340_v30, %v417_v25  ;;  %v426_v36 = vshrl.u32 %v1336_v56, %v417_v25  ;;  %v418_v39 = vshrl.u32 %v1338_v20, %v417_v25 }
  0x9f   :  { %v429_v41 = vshrl.u32 %v1335_v48, %v417_v25  ;;  %v432_v42 = vshrl.u32 %v1337_v58, %v417_v25  ;;  %vm436_vm6 = vcmp.lt.s32.totalorder %v415_v15, 3  ;;  %vm309_vm7 = vcmp.gt.s32.totalorder %v308_v28, 0 }
  0xa0   :  { %v421_v44 = vor.u32 %v420_v34, %v419_v26  ;;  %v424_v47 = vor.u32 %v423_v35, %v422_v27  ;;  %v427_v49 = vor.u32 %v426_v36, %v425_v31  ;;  %vm437_vm8 = vcmp.lt.s32.totalorder %v415_v15, 4 }
  0xa1   :  { %v430_v50 = vor.u32 %v429_v41, %v428_v32  ;;  %v433_v51 = vor.u32 %v432_v42, %v431_v33  ;;  %v310_v53 = vsel %vm309_vm7, %v308_v28, 0  ;;  %v1527_v28 = vor.u32 %v108_v23, %v107_v21 }
  0xa2   :  { %v438_v54 = vsel %vm434_vm4, %v418_v39, %v421_v44  ;;  %v439_v57 = vsel %vm437_vm8, %v427_v49, 2102212464  ;;  %v442_v60 = vsel %vm434_vm4, %v421_v44, %v424_v47  ;;  %v446_v61 = vsel %vm434_vm4, %v424_v47, %v427_v49 }
  0xa3   :  { %v440_v1 = vsel %vm436_vm6, %v424_v47, %v439_v57  ;;  %v443_v3 = vsel %vm437_vm8, %v430_v50, 920167782  ;;  %v447_v4 = vsel %vm437_vm8, %v433_v51, 1326507024  ;;  %v311_v5 = vshrl.u32 %v310_v53, 5 }
  0xa4   :  { %v441_v11 = vsel %vm435_vm5, %v438_v54, %v440_v1  ;;  %v444_v12 = vsel %vm436_vm6, %v427_v49, %v443_v3  ;;  %v448_v16 = vsel %vm436_vm6, %v430_v50, %v447_v4  ;;  %v312_v25 = vand.u32 31, %v310_v53 }
  0xa5   :  { %v445_v26 = vsel %vm435_vm5, %v442_v60, %v444_v12  ;;  %v449_v27 = vsel %vm435_vm5, %v446_v61, %v448_v16  ;;  %v110_v31 = vshll.u32 %v1339_v22, %v1438_v40  ;;  %v457_v36 = vmul.u32 %v1499_v17, %v441_v11 }
  0xa6   :  { %v1532_v32 = vmul.u32.u64.low %v1499_v17, %v449_v27  ;;  %v1533_v33 = vmul.u32.u64.high %v1499_v17, %v449_v27, %v1532_v32  ;;  %v1536_v34 = vmul.u32.u64.low %v1499_v17, %v445_v26  ;;  %v1537_v35 = vmul.u32.u64.high %v1499_v17, %v445_v26, %v1536_v34 }
  0xa7   :  { %v313_v39 = vsub.s32 32, %v312_v25  ;;  %vm330_vm9 = vcmp.lt.s32.totalorder %v311_v5, 1  ;;  %v111_v15 = vshrl.u32 %v1340_v30, %v1445_v45  ;;  %v315_v21 = vshll.u32 %v1338_v20, %v312_v25 }
  0xa8   :  { %v318_v23 = vshll.u32 %v1339_v22, %v312_v25  ;;  %v321_v41 = vshll.u32 %v1340_v30, %v312_v25  ;;  %v324_v42 = vshll.u32 %v1336_v56, %v312_v25  ;;  %v327_v17 = vshll.u32 %v1335_v48, %v312_v25 }
  0xa9   :  { %v316_v44 = vshrl.u32 %v1339_v22, %v313_v39  ;;  %v319_v47 = vshrl.u32 %v1340_v30, %v313_v39  ;;  %v322_v49 = vshrl.u32 %v1336_v56, %v313_v39  ;;  %vm459_vm10 = vc.u32 %v1533_v33, %v1536_v34 }
  0xaa   :  { %v460_v50 = vadd.s32 1, %v1537_v35  ;;  %v314_v51 = vshrl.u32 %v1338_v20, %v313_v39  ;;  %v325_v53 = vshrl.u32 %v1335_v48, %v313_v39  ;;  %v328_v61 = vshrl.u32 %v1337_v58, %v313_v39 }
  0xab   :  { %v317_v54 = vor.u32 %v316_v44, %v315_v21  ;;  %v320_v57 = vor.u32 %v319_v47, %v318_v23  ;;  %v323_v60 = vor.u32 %v322_v49, %v321_v41  ;;  %vm332_vm11 = vcmp.lt.s32.totalorder %v311_v5, 3 }
  0xac   :  { %v461_v1 = vsel %vm459_vm10, %v460_v50, %v1537_v35  ;;  %v326_v3 = vor.u32 %v325_v53, %v324_v42  ;;  %vm333_vm12 = vcmp.lt.s32.totalorder %v311_v5, 4  ;;  %v329_v11 = vor.u32 %v328_v61, %v327_v17 }
  0xad   :  { %v462_v4 = vadd.s32 %v461_v1, %v457_v36  ;;  %v334_v12 = vsel %vm330_vm9, %v314_v51, %v317_v54  ;;  %v335_v16 = vsel %vm333_vm12, %v323_v60, 2102212464  ;;  %v338_v26 = vsel %vm330_vm9, %v317_v54, %v320_v57 }
  0xae   :  { %v336_v25 = vsel %vm332_vm11, %v320_v57, %v335_v16  ;;  %v339_v27 = vsel %vm333_vm12, %v326_v3, 920167782  ;;  %v342_v32 = vsel %vm330_vm9, %v320_v57, %v323_v60  ;;  %vm331_vm13 = vcmp.lt.s32.totalorder %v311_v5, 2 }
  0xaf   :  { %v463_v21 = vadd.s32 536870912, %v462_v4  ;;  %v340_v39 = vsel %vm332_vm11, %v323_v60, %v339_v27  ;;  %v343_v35 = vsel %vm333_vm12, %v329_v11, 1326507024  ;;  %v337_v23 = vsel %vm331_vm13, %v334_v12, %v336_v25 }
  0xb0   :  { %v341_v41 = vsel %vm331_vm13, %v338_v26, %v340_v39  ;;  %v344_v36 = vsel %vm332_vm11, %v326_v3, %v343_v35  ;;  %v112_v42 = vor.u32 %v111_v15, %v110_v31  ;;  %v113_v53 = vshll.u32 %v1340_v30, %v1438_v40 }
  0xb1   :  { %v1564_v44 = vshrl.u32 %v463_v21, 30  ;;  %v345_v47 = vsel %vm331_vm13, %v342_v32, %v344_v36  ;;  %v1567_v49 = vmul.u32.u64.low %v1501_v19, %v341_v41  ;;  %v1568_v17 = vmul.u32.u64.high %v1501_v19, %v341_v41, %v1567_v49 }
  0xb2   :  { %v1572_v50 = vmul.u32.u64.low %v1501_v19, %v345_v47  ;;  %v1573_v51 = vmul.u32.u64.high %v1501_v19, %v345_v47, %v1572_v50  ;;  %v114_v5 = vshrl.u32 %v1336_v56, %v1445_v45  ;;  %v135_v31 = vsel %vm125_vm2, %v121_v7, 1326507024 }
  0xb3   :  { %v221_v15 = vshrl.u32 %v1335_v48, %v1484_v9  ;;  %v465_v54 = vshll.u32 %v1564_v44, 30  ;;  %v353_v57 = vmul.u32 %v1501_v19, %v337_v23  ;;  %v106_v40 = vshrl.u32 %v1338_v20, %v1445_v45 }
  0xb4   :  { %v115_v60 = vor.u32 %v114_v5, %v113_v53  ;;  %v130_v59 = vsel %vm122_vm14, %v1527_v28, %v112_v42  ;;  %v356_v7 = vadd.s32 1, %v1568_v17  ;;  %vm355_vm1 = vc.u32 %v1573_v51, %v1567_v49 }
  0xb5   :  { %v1594_v0 = vsub.s32 %v462_v4, %v465_v54  ;;  %v136_v61 = vsel %vm124_vm0, %v1466_v63, %v135_v31  ;;  %v224_v1 = vshrl.u32 %v1337_v58, %v1484_v9  ;;  %v126_v16 = vsel %vm122_vm14, %v106_v40, %v1527_v28 }
  0xb6   :  { %v127_v19 = vsel %vm125_vm2, %v115_v60, 2102212464  ;;  %v132_v45 = vsel %vm124_vm0, %v115_v60, %v1493_v13  ;;  %v357_v4 = vsel %vm355_vm1, %v356_v7, %v1568_v17  ;;  %v134_v13 = vsel %vm122_vm14, %v112_v42, %v115_v60 }
  0xb7   :  { %v468_v3 = vsub.s32 0, %v1594_v0  ;;  %v133_v11 = vsel %vm123_vm15, %v130_v59, %v132_v45  ;;  %v358_v12 = vadd.s32 %v357_v4, %v353_v57  ;;  %v128_v25 = vsel %vm124_vm0, %v112_v42, %v127_v19 }
  0xb8   :  { %v137_v26 = vsel %vm123_vm15, %v134_v13, %v136_v61  ;;  %v1620_v27 = vmul.u32.u64.low %v1472_v2, %v133_v11  ;;  %v1621_v32 = vmul.u32.u64.high %v1472_v2, %v133_v11, %v1620_v27  ;;  %v212_v28 = vshrl.u32 %v1339_v22, %v1484_v9 }
  0xb9   :  { %v1157_v63 = vmin.u32 %v468_v3, %v1594_v0  ;;  %v359_v21 = vadd.s32 536870912, %v358_v12  ;;  %v1625_v39 = vmul.u32.u64.low %v1472_v2, %v137_v26  ;;  %v1626_v35 = vmul.u32.u64.high %v1472_v2, %v137_v26, %v1625_v39 }
  0xba   :  { %vm229_vm2 = vcmp.lt.s32.totalorder %v1481_v8, 4  ;;  %v129_v41 = vsel %vm123_vm15, %v126_v16, %v128_v25  ;;  %v215_v36 = vshrl.u32 %v1340_v30, %v1484_v9  ;;  %v222_v42 = vor.u32 %v221_v15, %v1488_v10 }
  0xbb   :  { %v470_v23 = vclz %v1157_v63  ;;  %v1636_v47 = vshrl.u32 %v359_v21, 30  ;;  %v211_v17 = vshll.u32 %v1338_v20, %v1464_v62  ;;  %v218_v50 = vshrl.u32 %v1336_v56, %v1484_v9 }
  0xbc   :  { %v225_v53 = vor.u32 %v224_v1, %v1497_v14  ;;  %v148_v5 = vadd.s32 1, %v1621_v32  ;;  %v217_v31 = vshll.u32 %v1340_v30, %v1464_v62  ;;  %v145_v15 = vmul.u32 %v1472_v2, %v129_v41 }
  0xbd   :  { %v361_v10 = vshll.u32 %v1636_v47, 30  ;;  %vm147_vm3 = vc.u32 %v1626_v35, %v1620_v27  ;;  %v213_v54 = vor.u32 %v212_v28, %v211_v17  ;;  %v1158_v57 = vadd.s32 4294967294, %v470_v23 }
  0xbe   :  { %v149_v40 = vsel %vm147_vm3, %v148_v5, %v1621_v32  ;;  %v216_v14 = vor.u32 %v215_v36, %v214_v52  ;;  %v219_v60 = vor.u32 %v218_v50, %v217_v31  ;;  %v235_v59 = vsel %vm229_vm2, %v222_v42, 920167782 }
  0xbf   :  { %v1655_v7 = vsub.s32 %v358_v12, %v361_v10  ;;  %v150_v19 = vadd.s32 %v149_v40, %v145_v15  ;;  %v239_v62 = vsel %vm229_vm2, %v225_v53, 1326507024  ;;  %v202_v2 = vor.u32 8388608, %v1476_v6 }
  0xc0   :  { %vm226_vm4 = vcmp.lt.s32.totalorder %v1481_v8, 1  ;;  %vm228_vm5 = vcmp.lt.s32.totalorder %v1481_v8, 3  ;;  %vm1159_vm6 = vcmp.lt.s32.totalorder %v1158_v57, 0  ;;  %vm227_vm7 = vcmp.lt.s32.totalorder %v1481_v8, 2 }
  0xc1   :  { %v364_v45 = vsub.s32 0, %v1655_v7  ;;  %v151_v61 = vadd.s32 536870912, %v150_v19  ;;  %v234_v1 = vsel %vm226_vm4, %v213_v54, %v216_v14  ;;  %v236_v3 = vsel %vm228_vm5, %v219_v60, %v235_v59 }
  0xc2   :  { %v238_v4 = vsel %vm226_vm4, %v216_v14, %v219_v60  ;;  %v240_v12 = vsel %vm228_vm5, %v222_v42, %v239_v62  ;;  %v242_v25 = vshll.u32 %v202_v2, 8  ;;  %v473_v13 = vsel %vm1159_vm6, 0, %v1158_v57 }
  0xc3   :  { %v1153_v11 = vmin.u32 %v364_v45, %v1655_v7  ;;  %v1670_v6 = vshrl.u32 %v151_v61, 30  ;;  %v241_v16 = vsel %vm227_vm7, %v238_v4, %v240_v12  ;;  %v237_v32 = vsel %vm227_vm7, %v234_v1, %v236_v3 }
  0xc4   :  { %v1680_v21 = vmul.u32.u64.low %v242_v25, %v241_v16  ;;  %v1681_v39 = vmul.u32.u64.high %v242_v25, %v241_v16, %v1680_v21  ;;  %v231_v41 = vsel %vm229_vm2, %v219_v60, 2102212464  ;;  %v478_v36 = vsub.s32 4294967266, %v473_v13 }
  0xc5   :  { %v366_v63 = vclz %v1153_v11  ;;  %v153_v26 = vshll.u32 %v1670_v6, 30  ;;  %v210_v42 = vshrl.u32 %v1338_v20, %v1484_v9  ;;  %v232_v31 = vsel %vm228_vm5, %v216_v14, %v231_v41 }
  0xc6   :  { %v1687_v17 = vmul.u32.u64.low %v242_v25, %v237_v32  ;;  %v1688_v50 = vmul.u32.u64.high %v242_v25, %v237_v32, %v1687_v17  ;;  %v479_v57 = vadd.s32 127, %v478_v36  ;;  %v474_v60 = vsub.s32 32, %v473_v13  ;;  %v506_v32 = vld [vmem:[%s2108_s3] sm:$0xff] }
  0xc7   :  { %v1154_v28 = vadd.s32 4294967294, %v366_v63  ;;  %v154_v23 = vsub.s32 %v150_v19, %v153_v26  ;;  %v230_v52 = vsel %vm226_vm4, %v210_v42, %v213_v54  ;;  %v458_v54 = vadd.s32 %v1536_v34, %v1533_v33 }
  0xc8   :  { %v252_v40 = vadd.s32 1, %v1688_v50  ;;  %v233_v59 = vsel %vm227_vm7, %v230_v52, %v232_v31  ;;  %vm251_vm9 = vc.u32 %v1681_v39, %v1687_v17  ;;  %v480_v2 = vshll.u32 %v479_v57, 23 }
  0xc9   :  { %vm1155_vm8 = vcmp.lt.s32.totalorder %v1154_v28, 0  ;;  %v156_v53 = vsub.s32 0, %v154_v23  ;;  %v249_v45 = vmul.u32 %v242_v25, %v233_v59  ;;  %v476_v1 = vshrl.u32 %v458_v54, %v474_v60 }
  0xca   :  { %v369_v5 = vsel %vm1155_vm8, 0, %v1154_v28  ;;  %v253_v61 = vsel %vm251_vm9, %v252_v40, %v1688_v50  ;;  %v354_v3 = vadd.s32 %v1567_v49, %v1573_v51  ;;  %v475_v12 = vshll.u32 %v1594_v0, %v473_v13 }
  0xcb   :  { %v374_v10 = vsub.s32 4294967266, %v369_v5  ;;  %v1145_v15 = vmin.u32 %v156_v53, %v154_v23  ;;  %v370_v14 = vsub.s32 32, %v369_v5  ;;  %v254_v11 = vadd.s32 %v253_v61, %v249_v45 }
  0xcc   :  { %v481_v26 = vor.u32 4788187, %v480_v2  ;;  %v146_v34 = vadd.s32 %v1620_v27, %v1626_v35  ;;  %v477_v21 = vor.u32 %v476_v1, %v475_v12  ;;  %v371_v49 = vshll.u32 %v1655_v7, %v369_v5 }
  0xcd   :  { %v158_v9 = vclz %v1145_v15  ;;  %v375_v19 = vadd.s32 127, %v374_v10  ;;  %v372_v33 = vshrl.u32 %v354_v3, %v370_v14  ;;  %v255_v25 = vadd.s32 536870912, %v254_v11 }
  0xce   :  { %vm534_vm11 = vcmask 261120   ;;  %v482_v13 = vand.u32 2147483647, %v481_v26  ;;  %v484_v53 = vcvt.s32.f32 %v477_v21  ;;  %vm404_vm12 = vcmp.lt.s32.totalorder %v1434_v37, 0 }
  0xcf   :  { %v1146_v62 = vadd.s32 4294967294, %v158_v9  ;;  %v376_v8 = vshll.u32 %v375_v19, 23  ;;  %v1712_v36 = vshrl.u32 %v255_v25, 30  ;;  %1202 = vmatprep.mubr.msk.f32.mxu0 %vm534_vm11, %v506_v32  ;;  %v373_v42 = vor.u32 %v372_v33, %v371_v49 }
  0xd0   :  { %v485_v7 = vmul.f32 %v484_v53, %v482_v13  ;;  %vm1721_vm14 = vcmp.le.f32.partialorder %v402_v43, 0.7853982  ;;  %vm300_vm15 = vcmp.lt.s32.totalorder %v1436_v38, 0  ;;  %v250_v3 = vadd.s32 %v1687_v17, %v1681_v39 }
  0xd1   :  { %vm1147_vm10 = vcmp.lt.s32.totalorder %v1146_v62, 0  ;;  %v377_v28 = vor.u32 4788187, %v376_v8  ;;  %v257_v35 = vshll.u32 %v1712_v36, 30  ;;  %v380_v5 = vcvt.s32.f32 %v373_v42 }
  0xd2   :  { %v161_v4 = vsel %vm1147_vm10, 0, %v1146_v62  ;;  %v486_v59 = vxor.u32 2147483648, %v485_v7  ;;  %vm1735_vm0 = vcmp.le.f32.partialorder %v298_v46, 0.7853982  ;;  %vm92_vm1 = vcmp.lt.s32.totalorder %v1427_v18, 0 }
  0xd3   :  { %v162_v16 = vsub.s32 32, %v161_v4  ;;  %v166_v63 = vsub.s32 4294967266, %v161_v4  ;;  %v163_v27 = vshll.u32 %v154_v23, %v161_v4  ;;  %v378_v52 = vand.u32 2147483647, %v377_v28 }
  0xd4   :  { %v258_v10 = vsub.s32 %v254_v11, %v257_v35  ;;  %v487_v23 = vsel %vm404_vm12, %v486_v59, %v485_v7  ;;  %vm1747_vm2 = vcmp.le.f32.partialorder %v90_v29, 0.7853982  ;;  %v488_v32 = vsub.s32 4, %v1564_v44 }
  0xd5   :  { %v167_v51 = vadd.s32 127, %v166_v63  ;;  %v164_v41 = vshrl.u32 %v146_v34, %v162_v16  ;;  %v381_v40 = vmul.f32 %v380_v5, %v378_v52  ;;  %v490_v11 = vsel %vm1721_vm14, %v1434_v37, %v487_v23 }
  0xd6   :  { %v260_v57 = vsub.s32 0, %v258_v10  ;;  %1278 = vcosq.f32 %v490_v11  ;;  %v384_v34 = vsub.s32 4, %v1636_v47  ;;  %v176_v29 = vsub.s32 4, %v1670_v6 }
  0xd7   :  { %v168_v0 = vshll.u32 %v167_v51, 23  ;;  %v165_v31 = vor.u32 %v164_v41, %v163_v27  ;;  %v382_v62 = vxor.u32 2147483648, %v381_v40  ;;  %1280 = vsinq.f32 %v490_v11 }
  0xd8   :  { %v1149_v9 = vmin.u32 %v260_v57, %v258_v10  ;;  %v385_v28 = vsel %vm300_vm15, %v384_v34, %v1636_v47  ;;  %v280_v41 = vsub.s32 4, %v1712_v36  ;;  %v177_v42 = vsel %vm92_vm1, %v176_v29, %v1670_v6 }
  0xd9   :  { %v169_v50 = vor.u32 4788187, %v168_v0  ;;  %v172_v60 = vcvt.s32.f32 %v165_v31  ;;  %v383_v1 = vsel %vm300_vm15, %v382_v62, %v381_v40  ;;  %v489_v0 = vsel %vm404_vm12, %v488_v32, %v1564_v44 }
  0xda   :  { %v262_v54 = vclz %v1149_v9  ;;  %v386_v17 = vsel %vm1735_vm0, %v1436_v38, %v383_v1  ;;  %v387_v27 = vsel %vm1735_vm0, 0, %v385_v28  ;;  %vm196_vm3 = vcmp.lt.s32.totalorder %v1430_v24, 0 }
  0xdb   :  { %v170_v15 = vand.u32 2147483647, %v169_v50  ;;  %1282 = vcosq.f32 %v386_v17  ;;  %v491_v47 = vsel %vm1721_vm14, 0, %v489_v0  ;;  %v281_v50 = vsel %vm196_vm3, %v280_v41, %v1712_v36  ;;  %v522_v41 = vpop.permute.xlu1 %521  ;;  %v517_v0 = vpop.permute.xlu0 %516 }
  0xdc   :  { %v1150_v2 = vadd.s32 4294967294, %v262_v54  ;;  %1284 = vsinq.f32 %v386_v17  ;;  %v179_v44 = vsel %vm1747_vm2, 0, %v177_v42  ;;  %vm195_vm4 = vcmp.le.f32.partialorder %v194_v55, 0.7853982 }
  0xdd   :  { %v173_v19 = vmul.f32 %v172_v60, %v170_v15  ;;  %v391_v6 = vadd.s32 3, %v387_v27  ;;  %v495_v7 = vadd.s32 3, %v491_v47  ;;  %v283_v15 = vsel %vm195_vm4, 0, %v281_v50 }
  0xde   :  { %vm1151_vm13 = vcmp.lt.s32.totalorder %v1150_v2, 0  ;;  %v183_v40 = vadd.s32 3, %v179_v44  ;;  %v287_v59 = vadd.s32 3, %v283_v15  ;;  %vm390_vm0 = vweird.f32 %v1436_v38  ;;  %v508_v38 = vld [vmem:[%s2108_s3 + $0x10] sm:$0xff] }
  0xdf   :  { %v174_v14 = vxor.u32 2147483648, %v173_v19  ;;  %v265_v61 = vsel %vm1151_vm13, 0, %v1150_v2  ;;  %v392_v60 = vand.u32 3, %v391_v6  ;;  %v527_v15 = vpop.permute.xlu0 %526 }
  0xe0   :  { %v266_v8 = vsub.s32 32, %v265_v61  ;;  %v270_v4 = vsub.s32 4294967266, %v265_v61  ;;  %v267_v16 = vshll.u32 %v258_v10, %v265_v61  ;;  %v1279_v53 = vpop.eup %1278  ;;  %v184_v23 = vand.u32 3, %v183_v40 }
  0xe1   :  { %v175_v12 = vsel %vm92_vm1, %v174_v14, %v173_v19  ;;  %v1281_v31 = vpop.eup %1280  ;;  %v496_v19 = vand.u32 3, %v495_v7  ;;  %v502_v2 = vxor.u32 2147483648, %v1279_v53  ;;  %vm394_vm5 = vcmp.eq.s32.totalorder %v392_v60, 0 }
  0xe2   :  { %v268_v63 = vshrl.u32 %v250_v3, %v266_v8  ;;  %v271_v39 = vadd.s32 127, %v270_v4  ;;  %v178_v25 = vsel %vm1747_vm2, %v1427_v18, %v175_v12  ;;  %v499_v55 = vxor.u32 2147483648, %v1281_v31 }
  0xe3   :  { %1286 = vcosq.f32 %v178_v25  ;;  %v288_v61 = vand.u32 3, %v287_v59  ;;  %vm397_vm6 = vcmp.eq.s32.totalorder %v392_v60, 2  ;;  %vm498_vm7 = vcmp.eq.s32.totalorder %v496_v19, 0 }
  0xe4   :  { %v269_v46 = vor.u32 %v268_v63, %v267_v16  ;;  %v272_v33 = vshll.u32 %v271_v39, 23  ;;  %1288 = vsinq.f32 %v178_v25  ;;  %vm501_vm8 = vcmp.eq.s32.totalorder %v496_v19, 2 }
  0xe5   :  { %v1283_v5 = vpop.eup %1282  ;;  %v500_v8 = vsel %vm498_vm7, %v1279_v53, %v499_v55  ;;  %v503_v4 = vsel %vm501_vm8, %v502_v2, %v1281_v31  ;;  %vm186_vm9 = vcmp.eq.s32.totalorder %v184_v23, 0  ;;  %vm189_vm10 = vcmp.eq.s32.totalorder %v184_v23, 2  ;;  %v532_v53 = vpop.permute.xlu1 %531 }
  0xe6   :  { %v273_v21 = vor.u32 4788187, %v272_v33  ;;  %v276_v51 = vcvt.s32.f32 %v269_v46  ;;  %v1285_v57 = vpop.eup %1284  ;;  %v398_v62 = vxor.u32 2147483648, %v1283_v5  ;;  %vm393_vm12 = vcmp.lt.s32.totalorder %v392_v60, 2 }
  0xe7   :  { %v395_v54 = vxor.u32 2147483648, %v1285_v57  ;;  %vm497_vm13 = vcmp.lt.s32.totalorder %v496_v19, 2  ;;  %vm185_vm14 = vcmp.lt.s32.totalorder %v184_v23, 2  ;;  %vm293_vm15 = vcmp.eq.s32.totalorder %v288_v61, 2 }
  0xe8   :  { %v274_v49 = vand.u32 2147483647, %v273_v21  ;;  %v399_v3 = vsel %vm397_vm6, %v398_v62, %v1285_v57  ;;  %v504_v17 = vsel %vm497_vm13, %v500_v8, %v503_v4  ;;  %vm290_vm1 = vcmp.eq.s32.totalorder %v288_v61, 0 }
  0xe9   :  { %v396_v1 = vsel %vm394_vm5, %v1283_v5, %v395_v54  ;;  %vm494_vm2 = vweird.f32 %v1434_v37  ;;  %vm286_vm5 = vweird.f32 %v1430_v24  ;;  %v507_v37 = vld [vmem:[%s2108_s3 + $0x8] sm:$0xff] }
  0xea   :  { %v277_v13 = vmul.f32 %v276_v51, %v274_v49  ;;  %v400_v39 = vsel %vm393_vm12, %v396_v1, %v399_v3  ;;  %v505_v32 = vsel %vm494_vm2, nan, %v504_v17 }
  0xeb   :  { %v401_v25 = vsel %vm390_vm0, nan, %v400_v39 }
  0xec   :  { %v278_v35 = vxor.u32 2147483648, %v277_v13  ;;  %v1223_v28 = vpack.c.bf16 %v505_v32, %v401_v25 }
  0xed   :  { %v1287_v36 = vpop.eup %1286 }
  0xee   :  { %v279_v52 = vsel %vm196_vm3, %v278_v35, %v277_v13  ;;  %v1289_v9 = vpop.eup %1288  ;;  %v190_v45 = vxor.u32 2147483648, %v1287_v36  ;;  %vm289_vm3 = vcmp.lt.s32.totalorder %v288_v61, 2 }
  0xef   :  { %v282_v10 = vsel %vm195_vm4, %v1430_v24, %v279_v52  ;;  %v187_v14 = vxor.u32 2147483648, %v1289_v9  ;;  %vm182_vm4 = vweird.f32 %v1427_v18  ;;  %v509_v18 = vld [vmem:[%s2108_s3 + $0x18] sm:$0xff]  ;;  %v1341_v24 = vmov 0.0|0.0  }
  0xf0   :  { %1290 = vcosq.f32 %v282_v10  ;;  %v191_v12 = vsel %vm189_vm10, %v190_v45, %v1289_v9  ;;  %1227 = vmatprep.subr.bf16.mxu1 %v1341_v24 }
  0xf1   :  { %1292 = vsinq.f32 %v282_v10  ;;  %v188_v43 = vsel %vm186_vm9, %v1287_v36, %v187_v14 }
  0xf2   :  { %v192_v46 = vsel %vm185_vm14, %v188_v43, %v191_v12 }
  0xf3   :  { %v193_v29 = vsel %vm182_vm4, nan, %v192_v46 }
  0xfa   :  { %v1291_v11 = vpop.eup %1290 }
  0xfb   :  { %v1293_v16 = vpop.eup %1292  ;;  %v294_v63 = vxor.u32 2147483648, %v1291_v11 }
  0xfc   :  { %v291_v26 = vxor.u32 2147483648, %v1293_v16 }
  0xfd   :  { %v295_v33 = vsel %vm293_vm15, %v294_v63, %v1293_v16 }
  0xfe   :  { %v292_v34 = vsel %vm290_vm1, %v1291_v11, %v291_v26 }
  0xff   :  { %v296_v21 = vsel %vm289_vm3, %v292_v34, %v295_v33 }
 0x100   :  { %v297_v49 = vsel %vm286_vm5, nan, %v296_v21 }
 0x101   :  { %v1219_v51 = vpack.c.bf16 %v297_v49, %v193_v29 }
 0x103   :  { %1220 = vmatprep.subr.bf16.mxu0 %v1219_v51 }
 0x104   :  { %1222 = vmatpush3.bf16.msra.mxu0 %v1219_v51 }
 0x105   :  { %1224 = vmatprep.subr.bf16.mxu0 %v1223_v28 }
 0x108   :  { %1226 = vmatpush3.bf16.msra.mxu0 %v1223_v28 }
 0x10b   :  { %1203 = vmatmul.mubr.msk.f32.vlgmr.msra.gmra.mrb[0].mxu0 %vm534_vm11, %v507_v37 }
 0x10c   :  { %1205 = vmatprep.mubr.msk.f32.mxu0 %vm534_vm11, %v508_v38 }
 0x10f   :  { %1206 = vmatmul.mubr.msk.f32.gmra.mrb[2].mxu0 %vm534_vm11, %v509_v18 }
 0x1de   :  { %v1204_v13 = vpop.f32.mrb[0].mxu0 }
 0x1df   :  { %v1795_v42 = vadd.f32 %v1204_v13, %v522_v41  ;;  %v613_v27 = vpop.f32.mrb[1].mxu0 }
 0x1e0   :  { %v1797_v35 = vadd.f32 %v613_v27, %v517_v0 }
 0x1e1   :  { %v736_v47 = vand.u32 2147483647, %v1795_v42  ;;  %v739_v50 = vand.u32 2139095040, %v1795_v42 }
 0x1e2   :  { %v632_v44 = vand.u32 2147483647, %v1797_v35  ;;  %v635_v52 = vand.u32 2139095040, %v1797_v35  ;;  %v1207_v6 = vpop.f32.mrb[2].mxu0 }
 0x1e3   :  { %v740_v31 = vshrl.u32 %v739_v50, 23  ;;  %v743_v10 = vand.u32 8388607, %v736_v47  ;;  %v1805_v7 = vadd.f32 %v1207_v6, %v532_v53  ;;  %v623_v5 = vpop.f32.mrb[3].mxu0 }
 0x1e4   :  { %v636_v57 = vshrl.u32 %v635_v52, 23  ;;  %v639_v40 = vand.u32 8388607, %v632_v44  ;;  %v1810_v9 = vadd.f32 %v623_v5, %v527_v15 }
 0x1e5   :  { %v1168_v36 = vadd.s32 4294967169, %v740_v31  ;;  %v944_v60 = vand.u32 2147483647, %v1805_v7  ;;  %v744_v59 = vor.u32 8388608, %v743_v10  ;;  %v947_v54 = vand.u32 2139095040, %v1805_v7 }
 0x1e6   :  { %v1164_v19 = vadd.s32 4294967169, %v636_v57  ;;  %v640_v55 = vor.u32 8388608, %v639_v40  ;;  %v840_v45 = vand.u32 2147483647, %v1810_v9  ;;  %v843_v39 = vand.u32 2139095040, %v1810_v9 }
 0x1e7   :  { %v746_v62 = vadd.s32 1, %v1168_v36  ;;  %v948_v23 = vshrl.u32 %v947_v54, 23  ;;  %v1815_v14 = vand.u32 8388607, %v944_v60  ;;  %v1818_v1 = vshll.u32 %v744_v59, 8 }
 0x1e8   :  { %v642_v2 = vadd.s32 1, %v1164_v19  ;;  %v1820_v43 = vshll.u32 %v640_v55, 8 }
 0x1e9   :  { %vm747_vm6 = vcmp.gt.s32.totalorder %v746_v62, 0  ;;  %v1176_v3 = vadd.s32 4294967169, %v948_v23  ;;  %v952_v63 = vor.u32 8388608, %v1815_v14 }
 0x1ea   :  { %v748_v61 = vsel %vm747_vm6, %v746_v62, 0  ;;  %vm643_vm7 = vcmp.gt.s32.totalorder %v642_v2, 0 }
 0x1eb   :  { %v749_v8 = vshrl.u32 %v748_v61, 5  ;;  %v750_v4 = vand.u32 31, %v748_v61  ;;  %v644_v11 = vsel %vm643_vm7, %v642_v2, 0  ;;  %v1828_v33 = vadd.s32 1, %v1176_v3 }
 0x1ec   :  { %v1822_v12 = vshrl.u32 %v644_v11, 5  ;;  %v646_v16 = vand.u32 31, %v644_v11 }
 0x1ed   :  { %v751_v17 = vsub.s32 32, %v750_v4  ;;  %v753_v26 = vshll.u32 %v1338_v20, %v750_v4  ;;  %v756_v46 = vshll.u32 %v1339_v22, %v750_v4  ;;  %v759_v34 = vshll.u32 %v1340_v30, %v750_v4 }
 0x1ee   :  { %v762_v25 = vshll.u32 %v1336_v56, %v750_v4  ;;  %v765_v32 = vshll.u32 %v1335_v48, %v750_v4  ;;  %vm768_vm8 = vcmp.lt.s32.totalorder %v749_v8, 1  ;;  %vm769_vm9 = vcmp.lt.s32.totalorder %v749_v8, 2 }
 0x1ef   :  { %v754_v21 = vshrl.u32 %v1339_v22, %v751_v17  ;;  %v757_v29 = vshrl.u32 %v1340_v30, %v751_v17  ;;  %v760_v49 = vshrl.u32 %v1336_v56, %v751_v17  ;;  %v752_v51 = vshrl.u32 %v1338_v20, %v751_v17 }
 0x1f0   :  { %v763_v28 = vshrl.u32 %v1335_v48, %v751_v17  ;;  %v766_v37 = vshrl.u32 %v1337_v58, %v751_v17  ;;  %vm770_vm10 = vcmp.lt.s32.totalorder %v749_v8, 3  ;;  %v647_v0 = vsub.s32 32, %v646_v16 }
 0x1f1   :  { %v755_v38 = vor.u32 %v754_v21, %v753_v26  ;;  %v758_v18 = vor.u32 %v757_v29, %v756_v46  ;;  %v761_v41 = vor.u32 %v760_v49, %v759_v34  ;;  %vm771_vm12 = vcmp.lt.s32.totalorder %v749_v8, 4 }
 0x1f2   :  { %v764_v13 = vor.u32 %v763_v28, %v762_v25  ;;  %v767_v27 = vor.u32 %v766_v37, %v765_v32  ;;  %v649_v50 = vshll.u32 %v1338_v20, %v646_v16  ;;  %v652_v57 = vshll.u32 %v1339_v22, %v646_v16 }
 0x1f3   :  { %v772_v53 = vsel %vm768_vm8, %v752_v51, %v755_v38  ;;  %v773_v52 = vsel %vm771_vm12, %v761_v41, 2102212464  ;;  %v776_v6 = vsel %vm768_vm8, %v755_v38, %v758_v18  ;;  %v780_v31 = vsel %vm768_vm8, %v758_v18, %v761_v41 }
 0x1f4   :  { %v774_v10 = vsel %vm770_vm10, %v758_v18, %v773_v52  ;;  %v777_v5 = vsel %vm771_vm12, %v764_v13, 920167782  ;;  %v781_v15 = vsel %vm771_vm12, %v767_v27, 1326507024  ;;  %v648_v59 = vshrl.u32 %v1338_v20, %v647_v0 }
 0x1f5   :  { %v778_v40 = vsel %vm770_vm10, %v761_v41, %v777_v5  ;;  %v782_v36 = vsel %vm770_vm10, %v764_v13, %v781_v15  ;;  %v650_v19 = vshrl.u32 %v1339_v22, %v647_v0  ;;  %v775_v54 = vsel %vm769_vm9, %v772_v53, %v774_v10 }
 0x1f6   :  { %v779_v62 = vsel %vm769_vm9, %v776_v6, %v778_v40  ;;  %v783_v55 = vsel %vm769_vm9, %v780_v31, %v782_v36  ;;  %v653_v2 = vshrl.u32 %v1340_v30, %v647_v0  ;;  %v655_v26 = vshll.u32 %v1340_v30, %v646_v16 }
 0x1f7   :  { %v1854_v23 = vmul.u32.u64.low %v1818_v1, %v783_v55  ;;  %v1855_v61 = vmul.u32.u64.high %v1818_v1, %v783_v55, %v1854_v23  ;;  %v1858_v3 = vmul.u32.u64.low %v1818_v1, %v779_v62  ;;  %v1859_v4 = vmul.u32.u64.high %v1818_v1, %v779_v62, %v1858_v3 }
 0x1f8   :  { %v651_v11 = vor.u32 %v650_v19, %v649_v50  ;;  %v654_v17 = vor.u32 %v653_v2, %v652_v57  ;;  %v656_v46 = vshrl.u32 %v1336_v56, %v647_v0  ;;  %v791_v8 = vmul.u32 %v1818_v1, %v775_v54 }
 0x1f9   :  { %v658_v34 = vshll.u32 %v1336_v56, %v646_v16  ;;  %v659_v25 = vshrl.u32 %v1335_v48, %v647_v0  ;;  %v662_v32 = vshrl.u32 %v1337_v58, %v647_v0  ;;  %v661_v29 = vshll.u32 %v1335_v48, %v646_v16 }
 0x1fa   :  { %v657_v21 = vor.u32 %v656_v46, %v655_v26  ;;  %vm664_vm13 = vcmp.lt.s32.totalorder %v1822_v12, 1  ;;  %vm665_vm14 = vcmp.lt.s32.totalorder %v1822_v12, 2  ;;  %vm793_vm15 = vc.u32 %v1855_v61, %v1858_v3 }
 0x1fb   :  { %v794_v49 = vadd.s32 1, %v1859_v4  ;;  %v660_v51 = vor.u32 %v659_v25, %v658_v34  ;;  %vm666_vm0 = vcmp.lt.s32.totalorder %v1822_v12, 3  ;;  %v663_v1 = vor.u32 %v662_v32, %v661_v29 }
 0x1fc   :  { %vm667_vm1 = vcmp.lt.s32.totalorder %v1822_v12, 4  ;;  %v668_v28 = vsel %vm664_vm13, %v648_v59, %v651_v11  ;;  %v672_v37 = vsel %vm664_vm13, %v651_v11, %v654_v17  ;;  %v676_v41 = vsel %vm664_vm13, %v654_v17, %v657_v21 }
 0x1fd   :  { %v795_v38 = vsel %vm793_vm15, %v794_v49, %v1859_v4  ;;  %v669_v16 = vsel %vm667_vm1, %v657_v21, 2102212464  ;;  %v673_v18 = vsel %vm667_vm1, %v660_v51, 920167782  ;;  %v677_v50 = vsel %vm667_vm1, %v663_v1, 1326507024 }
 0x1fe   :  { %v796_v0 = vadd.s32 %v795_v38, %v791_v8  ;;  %v670_v13 = vsel %vm666_vm0, %v654_v17, %v669_v16  ;;  %v674_v27 = vsel %vm666_vm0, %v657_v21, %v673_v18  ;;  %v678_v6 = vsel %vm666_vm0, %v660_v51, %v677_v50 }
 0x1ff   :  { %v671_v53 = vsel %vm665_vm14, %v668_v28, %v670_v13  ;;  %v675_v52 = vsel %vm665_vm14, %v672_v37, %v674_v27  ;;  %vm955_vm2 = vcmp.gt.s32.totalorder %v1828_v33, 0  ;;  %v679_v10 = vsel %vm665_vm14, %v676_v41, %v678_v6 }
 0x200   :  { %v797_v31 = vadd.s32 536870912, %v796_v0  ;;  %v1885_v5 = vmul.u32.u64.low %v1820_v43, %v675_v52  ;;  %v1886_v15 = vmul.u32.u64.high %v1820_v43, %v675_v52, %v1885_v5  ;;  %v956_v36 = vsel %vm955_vm2, %v1828_v33, 0 }
 0x201   :  { %v1890_v57 = vmul.u32.u64.low %v1820_v43, %v679_v10  ;;  %v1891_v40 = vmul.u32.u64.high %v1820_v43, %v679_v10, %v1890_v57  ;;  %v844_v59 = vshrl.u32 %v843_v39, 23  ;;  %v958_v54 = vand.u32 31, %v956_v36 }
 0x202   :  { %v1896_v19 = vshrl.u32 %v797_v31, 30  ;;  %v687_v12 = vmul.u32 %v1820_v43, %v671_v53  ;;  %v1901_v62 = vshll.u32 %v952_v63, 8  ;;  %v1905_v55 = vand.u32 8388607, %v840_v45 }
 0x203   :  { %v690_v33 = vadd.s32 1, %v1886_v15  ;;  %v957_v23 = vshrl.u32 %v956_v36, 5  ;;  %v959_v4 = vsub.s32 32, %v958_v54  ;;  %vm689_vm3 = vc.u32 %v1891_v40, %v1885_v5 }
 0x204   :  { %v799_v2 = vshll.u32 %v1896_v19, 30  ;;  %v961_v39 = vshll.u32 %v1338_v20, %v958_v54  ;;  %v964_v43 = vshll.u32 %v1339_v22, %v958_v54  ;;  %v1172_v14 = vadd.s32 4294967169, %v844_v59 }
 0x205   :  { %v691_v11 = vsel %vm689_vm3, %v690_v33, %v1886_v15  ;;  %v962_v17 = vshrl.u32 %v1339_v22, %v959_v4  ;;  %v967_v26 = vshll.u32 %v1340_v30, %v958_v54  ;;  %v965_v8 = vshrl.u32 %v1340_v30, %v959_v4 }
 0x206   :  { %v1913_v63 = vsub.s32 %v796_v0, %v799_v2  ;;  %v692_v46 = vadd.s32 %v691_v11, %v687_v12  ;;  %v968_v34 = vshrl.u32 %v1336_v56, %v959_v4  ;;  %v970_v25 = vshll.u32 %v1336_v56, %v958_v54 }
 0x207   :  { %v963_v21 = vor.u32 %v962_v17, %v961_v39  ;;  %v971_v29 = vshrl.u32 %v1335_v48, %v959_v4  ;;  %v973_v49 = vshll.u32 %v1335_v48, %v958_v54  ;;  %v966_v1 = vor.u32 %v965_v8, %v964_v43 }
 0x208   :  { %v802_v32 = vsub.s32 0, %v1913_v63  ;;  %v693_v51 = vadd.s32 536870912, %v692_v46  ;;  %v969_v28 = vor.u32 %v968_v34, %v967_v26  ;;  %v974_v37 = vshrl.u32 %v1337_v58, %v959_v4 }
 0x209   :  { %v960_v16 = vshrl.u32 %v1338_v20, %v959_v4  ;;  %v972_v18 = vor.u32 %v971_v29, %v970_v25  ;;  %vm976_vm4 = vcmp.lt.s32.totalorder %v957_v23, 1  ;;  %vm978_vm5 = vcmp.lt.s32.totalorder %v957_v23, 3 }
 0x20a   :  { %v1169_v38 = vmin.u32 %v802_v32, %v1913_v63  ;;  %v694_v41 = vshrl.u32 %v693_v51, 30  ;;  %v975_v0 = vor.u32 %v974_v37, %v973_v49  ;;  %vm979_vm6 = vcmp.lt.s32.totalorder %v957_v23, 4 }
 0x20b   :  { %v980_v27 = vsel %vm976_vm4, %v960_v16, %v963_v21  ;;  %v981_v50 = vsel %vm979_vm6, %v969_v28, 2102212464  ;;  %v984_v53 = vsel %vm976_vm4, %v963_v21, %v966_v1  ;;  %v985_v31 = vsel %vm979_vm6, %v972_v18, 920167782 }
 0x20c   :  { %v804_v13 = vclz %v1169_v38  ;;  %v695_v52 = vshll.u32 %v694_v41, 30  ;;  %v982_v6 = vsel %vm978_vm5, %v966_v1, %v981_v50  ;;  %v988_v10 = vsel %vm976_vm4, %v966_v1, %v969_v28 }
 0x20d   :  { %vm977_vm7 = vcmp.lt.s32.totalorder %v957_v23, 2  ;;  %v986_v57 = vsel %vm978_vm5, %v969_v28, %v985_v31  ;;  %v989_v36 = vsel %vm979_vm6, %v975_v0, 1326507024  ;;  %v850_v34 = vadd.s32 1, %v1172_v14 }
 0x20e   :  { %v1170_v15 = vadd.s32 4294967294, %v804_v13  ;;  %v1929_v59 = vsub.s32 %v692_v46, %v695_v52  ;;  %v983_v54 = vsel %vm977_vm7, %v980_v27, %v982_v6  ;;  %v987_v12 = vsel %vm977_vm7, %v984_v53, %v986_v57 }
 0x20f   :  { %v990_v2 = vsel %vm978_vm5, %v972_v18, %v989_v36  ;;  %v1933_v4 = vmul.u32.u64.low %v1901_v62, %v987_v12  ;;  %v1934_v39 = vmul.u32.u64.high %v1901_v62, %v987_v12, %v1933_v4  ;;  %v792_v46 = vadd.s32 %v1858_v3, %v1855_v61 }
 0x210   :  { %vm1171_vm8 = vcmp.lt.s32.totalorder %v1170_v15, 0  ;;  %v991_v33 = vsel %vm977_vm7, %v988_v10, %v990_v2  ;;  %v698_v11 = vsub.s32 0, %v1929_v59  ;;  %v999_v21 = vmul.u32 %v1901_v62, %v983_v54 }
 0x211   :  { %v807_v43 = vsel %vm1171_vm8, 0, %v1170_v15  ;;  %v1939_v17 = vmul.u32.u64.low %v1901_v62, %v991_v33  ;;  %v1940_v26 = vmul.u32.u64.high %v1901_v62, %v991_v33, %v1939_v17  ;;  %v848_v29 = vor.u32 8388608, %v1905_v55 }
 0x212   :  { %v808_v8 = vsub.s32 32, %v807_v43  ;;  %v812_v23 = vsub.s32 4294967266, %v807_v43  ;;  %v809_v25 = vshll.u32 %v1913_v63, %v807_v43  ;;  %v1165_v32 = vmin.u32 %v698_v11, %v1929_v59 }
 0x213   :  { %v1002_v1 = vadd.s32 1, %v1934_v39  ;;  %vm851_vm9 = vcmp.gt.s32.totalorder %v850_v34, 0  ;;  %vm1001_vm10 = vc.u32 %v1940_v26, %v1933_v4  ;;  %v718_v3 = vsub.s32 4, %v694_v41 }
 0x214   :  { %v810_v49 = vshrl.u32 %v792_v46, %v808_v8  ;;  %v813_v51 = vadd.s32 127, %v812_v23  ;;  %v700_v28 = vclz %v1165_v32  ;;  %v852_v61 = vsel %vm851_vm9, %v850_v34, 0 }
 0x215   :  { %vm634_vm12 = vcmp.lt.s32.totalorder %v1797_v35, 0  ;;  %v1003_v63 = vsel %vm1001_vm10, %v1002_v1, %v1934_v39  ;;  %v688_v62 = vadd.s32 %v1885_v5, %v1891_v40  ;;  %v854_v16 = vand.u32 31, %v852_v61 }
 0x216   :  { %v811_v14 = vor.u32 %v810_v49, %v809_v25  ;;  %v814_v37 = vshll.u32 %v813_v51, 23  ;;  %v1166_v55 = vadd.s32 4294967294, %v700_v28  ;;  %v1004_v38 = vadd.s32 %v1003_v63, %v999_v21 }
 0x217   :  { %v1955_v0 = vshrl.u32 %v852_v61, 5  ;;  %v1957_v13 = vshll.u32 %v848_v29, 8  ;;  %v822_v27 = vsub.s32 4, %v1896_v19  ;;  %v855_v53 = vsub.s32 32, %v854_v16 }
 0x218   :  { %v815_v18 = vor.u32 4788187, %v814_v37  ;;  %vm1167_vm13 = vcmp.lt.s32.totalorder %v1166_v55, 0  ;;  %v1005_v50 = vadd.s32 536870912, %v1004_v38  ;;  %v1962_v52 = vsel %vm634_vm12, %v718_v3, %v694_v41 }
 0x219   :  { %v818_v31 = vcvt.s32.f32 %v811_v14  ;;  %v703_v5 = vsel %vm1167_vm13, 0, %v1166_v55  ;;  %v857_v40 = vshll.u32 %v1338_v20, %v854_v16  ;;  %v860_v36 = vshll.u32 %v1339_v22, %v854_v16 }
 0x21a   :  { %v816_v6 = vand.u32 2147483647, %v815_v18  ;;  %v704_v10 = vsub.s32 32, %v703_v5  ;;  %v708_v15 = vsub.s32 4294967266, %v703_v5  ;;  %v1965_v57 = vshrl.u32 %v1005_v50, 30 }
 0x21b   :  { %v705_v12 = vshll.u32 %v1929_v59, %v703_v5  ;;  %v858_v2 = vshrl.u32 %v1339_v22, %v855_v53  ;;  %v861_v33 = vshrl.u32 %v1340_v30, %v855_v53  ;;  %vm738_vm14 = vcmp.lt.s32.totalorder %v1795_v42, 0 }
 0x21c   :  { %v819_v54 = vmul.f32 %v818_v31, %v816_v6  ;;  %v706_v41 = vshrl.u32 %v688_v62, %v704_v10  ;;  %v709_v39 = vadd.s32 127, %v708_v15  ;;  %v1007_v43 = vshll.u32 %v1965_v57, 30 }
 0x21d   :  { %v864_v11 = vshrl.u32 %v1336_v56, %v855_v53  ;;  %v859_v17 = vor.u32 %v858_v2, %v857_v40  ;;  %v862_v46 = vor.u32 %v861_v33, %v860_v36  ;;  %v863_v8 = vshll.u32 %v1340_v30, %v854_v16 }
 0x21e   :  { %vm872_vm15 = vcmp.lt.s32.totalorder %v1955_v0, 1  ;;  %v707_v23 = vor.u32 %v706_v41, %v705_v12  ;;  %v710_v59 = vshll.u32 %v709_v39, 23  ;;  %v1976_v34 = vsub.s32 %v1004_v38, %v1007_v43 }
 0x21f   :  { %v866_v22 = vshll.u32 %v1336_v56, %v854_v16  ;;  %v865_v25 = vor.u32 %v864_v11, %v863_v8  ;;  %v867_v32 = vshrl.u32 %v1335_v48, %v855_v53  ;;  %v869_v21 = vshll.u32 %v1335_v48, %v854_v16 }
 0x220   :  { %v870_v29 = vshrl.u32 %v1337_v58, %v855_v53  ;;  %v820_v49 = vxor.u32 2147483648, %v819_v54  ;;  %v711_v51 = vor.u32 4788187, %v710_v59  ;;  %v1010_v1 = vsub.s32 0, %v1976_v34 }
 0x221   :  { %v856_v30 = vshrl.u32 %v1338_v20, %v855_v53  ;;  %v714_v28 = vcvt.s32.f32 %v707_v23  ;;  %v868_v61 = vor.u32 %v867_v32, %v866_v22  ;;  %vm874_vm0 = vcmp.lt.s32.totalorder %v1955_v0, 3 }
 0x222   :  { %v871_v3 = vor.u32 %v870_v29, %v869_v21  ;;  %v712_v14 = vand.u32 2147483647, %v711_v51  ;;  %v1177_v56 = vmin.u32 %v1010_v1, %v1976_v34  ;;  %vm875_vm1 = vcmp.lt.s32.totalorder %v1955_v0, 4 }
 0x223   :  { %v880_v48 = vsel %vm872_vm15, %v859_v17, %v862_v46  ;;  %v877_v58 = vsel %vm875_vm1, %v865_v25, 2102212464  ;;  %v881_v37 = vsel %vm875_vm1, %v868_v61, 920167782  ;;  %v884_v63 = vsel %vm872_vm15, %v862_v46, %v865_v25 }
 0x224   :  { %v885_v62 = vsel %vm875_vm1, %v871_v3, 1326507024  ;;  %v715_v20 = vmul.f32 %v714_v28, %v712_v14  ;;  %v1012_v55 = vclz %v1177_v56  ;;  %vm873_vm2 = vcmp.lt.s32.totalorder %v1955_v0, 2 }
 0x225   :  { %v882_v38 = vsel %vm874_vm0, %v865_v25, %v881_v37  ;;  %v821_v16 = vsel %vm738_vm14, %v820_v49, %v819_v54  ;;  %v876_v18 = vsel %vm872_vm15, %v856_v30, %v859_v17  ;;  %v886_v53 = vsel %vm874_vm0, %v868_v61, %v885_v62 }
 0x226   :  { %v883_v50 = vsel %vm873_vm2, %v880_v48, %v882_v38  ;;  %v716_v6 = vxor.u32 2147483648, %v715_v20  ;;  %v1178_v31 = vadd.s32 4294967294, %v1012_v55  ;;  %v878_v5 = vsel %vm874_vm0, %v862_v46, %v877_v58 }
 0x227   :  { %v887_v40 = vsel %vm873_vm2, %v884_v63, %v886_v53  ;;  %v2011_v36 = vmul.u32.u64.low %v1957_v13, %v883_v50  ;;  %v2012_v54 = vmul.u32.u64.high %v1957_v13, %v883_v50, %v2011_v36  ;;  %vm2019_vm4 = vcmp.le.f32.partialorder %v632_v44, 0.7853982 }
 0x228   :  { %v2007_v10 = vmul.u32.u64.low %v1957_v13, %v887_v40  ;;  %v2008_v15 = vmul.u32.u64.high %v1957_v13, %v887_v40, %v2007_v10  ;;  %v717_v12 = vsel %vm634_vm12, %v716_v6, %v715_v20  ;;  %vm1179_vm3 = vcmp.lt.s32.totalorder %v1178_v31, 0 }
 0x229   :  { %v1015_v33 = vsel %vm1179_vm3, 0, %v1178_v31  ;;  %v879_v41 = vsel %vm873_vm2, %v876_v18, %v878_v5  ;;  %v720_v39 = vsel %vm2019_vm4, %v1797_v35, %v717_v12  ;;  %vm2030_vm5 = vcmp.le.f32.partialorder %v736_v47, 0.7853982 }
 0x22a   :  { %v1020_v11 = vsub.s32 4294967266, %v1015_v33  ;;  %v721_v44 = vsel %vm2019_vm4, 0, %v1962_v52  ;;  %1294 = vcosq.f32 %v720_v39  ;;  %v824_v0 = vsel %vm2030_vm5, %v1795_v42, %v821_v16 }
 0x22b   :  { %vm897_vm6 = vc.u32 %v2008_v15, %v2011_v36  ;;  %v898_v17 = vadd.s32 1, %v2012_v54  ;;  %1296 = vsinq.f32 %v720_v39  ;;  %v823_v47 = vsel %vm738_vm14, %v822_v27, %v1896_v19 }
 0x22c   :  { %v1016_v46 = vsub.s32 32, %v1015_v33  ;;  %v1021_v8 = vadd.s32 127, %v1020_v11  ;;  %v895_v52 = vmul.u32 %v1957_v13, %v879_v41  ;;  %v1000_v23 = vadd.s32 %v1933_v4, %v1940_v26 }
 0x22d   :  { %v899_v59 = vsel %vm897_vm6, %v898_v17, %v2012_v54  ;;  %v725_v22 = vadd.s32 3, %v721_v44  ;;  %1298 = vcosq.f32 %v824_v0  ;;  %v825_v21 = vsel %vm2030_vm5, 0, %v823_v47 }
 0x22e   :  { %v1022_v25 = vshll.u32 %v1021_v8, 23  ;;  %v900_v32 = vadd.s32 %v899_v59, %v895_v52  ;;  %1300 = vsinq.f32 %v824_v0  ;;  %v1018_v29 = vshrl.u32 %v1000_v23, %v1016_v46 }
 0x22f   :  { %vm1342_vm7 = vmmov 0   ;;  %v1343_v19 = vmov 0.0   ;;  %v829_v27 = vadd.s32 3, %v825_v21  ;;  %v1017_v13 = vshll.u32 %v1976_v34, %v1015_v33 }
 0x230   :  { %v901_v49 = vadd.s32 536870912, %v900_v32  ;;  %1216 = vmatprep.mubr.msk.f32.mxu1 %vm1342_vm7, %v1343_v19  ;;  %v1023_v51 = vor.u32 4788187, %v1022_v25  ;;  %v726_v26 = vand.u32 3, %v725_v22  ;;  %vm724_vm12 = vweird.f32 %v1797_v35 }
 0x231   :  { %v1019_v30 = vor.u32 %v1018_v29, %v1017_v13  ;;  %v830_v14 = vand.u32 3, %v829_v27  ;;  %vm828_vm0 = vweird.f32 %v1795_v42  ;;  %vm946_vm2 = vcmp.lt.s32.totalorder %v1805_v7, 0 }
 0x232   :  { %v2055_v4 = vshrl.u32 %v901_v49, 30  ;;  %v1024_v56 = vand.u32 2147483647, %v1023_v51  ;;  %vm731_vm8 = vcmp.eq.s32.totalorder %v726_v26, 2  ;;  %vm727_vm9 = vcmp.lt.s32.totalorder %v726_v26, 2 }
 0x233   :  { %vm728_vm10 = vcmp.eq.s32.totalorder %v726_v26, 0  ;;  %v1026_v62 = vcvt.s32.f32 %v1019_v30  ;;  %vm835_vm13 = vcmp.eq.s32.totalorder %v830_v14, 2  ;;  %vm832_vm14 = vcmp.eq.s32.totalorder %v830_v14, 0 }
 0x234   :  { %v1295_v1 = vpop.eup %1294  ;;  %v903_v28 = vshll.u32 %v2055_v4, 30  ;;  %vm831_vm15 = vcmp.lt.s32.totalorder %v830_v14, 2  ;;  %v896_v39 = vadd.s32 %v2011_v36, %v2008_v15  ;;  %vm2068_vm3 = vcmp.le.f32.partialorder %v944_v60, 0.7853982 }
 0x235   :  { %v1297_v61 = vpop.eup %1296  ;;  %v732_v3 = vxor.u32 2147483648, %v1295_v1  ;;  %v1027_v50 = vmul.f32 %v1026_v62, %v1024_v56  ;;  %v1030_v8 = vsub.s32 4, %v1965_v57  ;;  %v926_v59 = vsub.s32 4, %v2055_v4 }
 0x236   :  { %v904_v48 = vsub.s32 %v900_v32, %v903_v28  ;;  %v729_v58 = vxor.u32 2147483648, %v1297_v61  ;;  %vm842_vm4 = vcmp.lt.s32.totalorder %v1810_v9, 0  ;;  %vm841_vm5 = vcmp.le.f32.partialorder %v840_v45, 0.7853982 }
 0x237   :  { %v1299_v37 = vpop.eup %1298  ;;  %v733_v63 = vsel %vm731_vm8, %v732_v3, %v1297_v61  ;;  %v1028_v12 = vxor.u32 2147483648, %v1027_v50  ;;  %v1031_v60 = vsel %vm946_vm2, %v1030_v8, %v1965_v57  ;;  %v927_v21 = vsel %vm842_vm4, %v926_v59, %v2055_v4 }
 0x238   :  { %v1301_v34 = vpop.eup %1300  ;;  %v906_v20 = vsub.s32 0, %v904_v48  ;;  %v730_v55 = vsel %vm728_vm10, %v1295_v1, %v729_v58  ;;  %v836_v38 = vxor.u32 2147483648, %v1299_v37  ;;  %v1033_v25 = vsel %vm2068_vm3, 0, %v1031_v60 }
 0x239   :  { %v734_v16 = vsel %vm727_vm9, %v730_v55, %v733_v63  ;;  %v833_v18 = vxor.u32 2147483648, %v1301_v34  ;;  %v1029_v41 = vsel %vm946_vm2, %v1028_v12, %v1027_v50  ;;  %v1037_v49 = vadd.s32 3, %v1033_v25  ;;  %v1053_v55 = vpop.permute.xlu0 %1052 }
 0x23a   :  { %v1173_v53 = vmin.u32 %v906_v20, %v904_v48  ;;  %v837_v6 = vsel %vm835_vm13, %v836_v38, %v1301_v34  ;;  %v735_v31 = vsel %vm724_vm12, nan, %v734_v16  ;;  %v929_v27 = vsel %vm841_vm5, 0, %v927_v21  ;;  %v1048_v20 = vld [vmem:[%s2110_s5] sm:$0xff] }
 0x23b   :  { %v834_v5 = vsel %vm832_vm14, %v1299_v37, %v833_v18  ;;  %v1038_v13 = vand.u32 3, %v1037_v49  ;;  %v933_v51 = vadd.s32 3, %v929_v27  ;;  %vm1036_vm12 = vweird.f32 %v1805_v7 }
 0x23c   :  { %v908_v40 = vclz %v1173_v53  ;;  %v838_v10 = vsel %vm831_vm15, %v834_v5, %v837_v6  ;;  %vm932_vm14 = vweird.f32 %v1810_v9 }
 0x23d   :  { %v839_v54 = vsel %vm828_vm0, nan, %v838_v10  ;;  %vm1040_vm6 = vcmp.eq.s32.totalorder %v1038_v13, 0  ;;  %vm1043_vm7 = vcmp.eq.s32.totalorder %v1038_v13, 2  ;;  %v934_v30 = vand.u32 3, %v933_v51 }
 0x23e   :  { %v1174_v2 = vadd.s32 4294967294, %v908_v40  ;;  %v1228_v33 = vpack.c.bf16 %v839_v54, %v735_v31  ;;  %vm1039_vm8 = vcmp.lt.s32.totalorder %v1038_v13, 2 }
 0x23f   :  { %vm939_vm9 = vcmp.eq.s32.totalorder %v934_v30, 2  ;;  %vm936_vm10 = vcmp.eq.s32.totalorder %v934_v30, 0  ;;  %vm935_vm13 = vcmp.lt.s32.totalorder %v934_v30, 2 }
 0x240   :  { %vm1175_vm1 = vcmp.lt.s32.totalorder %v1174_v2, 0  ;;  %1229 = vmatpush3.bf16.msra.mxu1 %v1228_v33 }
 0x241   :  { %v911_v35 = vsel %vm1175_vm1, 0, %v1174_v2  ;;  %1230 = vmatprep.subr.bf16.mxu1 %v1341_v24  ;;  %v1032_v24 = vsel %vm2068_vm3, %v1805_v7, %v1029_v41 }
 0x242   :  { %v912_v43 = vsub.s32 32, %v911_v35  ;;  %v916_v42 = vsub.s32 4294967266, %v911_v35  ;;  %v913_v44 = vshll.u32 %v904_v48, %v911_v35  ;;  %1302 = vcosq.f32 %v1032_v24 }
 0x243   :  { %1304 = vsinq.f32 %v1032_v24 }
 0x244   :  { %v914_v0 = vshrl.u32 %v896_v39, %v912_v43  ;;  %v917_v17 = vadd.s32 127, %v916_v42 }
 0x246   :  { %v915_v47 = vor.u32 %v914_v0, %v913_v44  ;;  %v918_v46 = vshll.u32 %v917_v17, 23 }
 0x248   :  { %v919_v15 = vor.u32 4788187, %v918_v46  ;;  %v922_v52 = vcvt.s32.f32 %v915_v47 }
 0x24a   :  { %v920_v36 = vand.u32 2147483647, %v919_v15 }
 0x24c   :  { %v923_v23 = vmul.f32 %v922_v52, %v920_v36  ;;  %v1303_v19 = vpop.eup %1302 }
 0x24d   :  { %v1305_v57 = vpop.eup %1304  ;;  %v1044_v1 = vxor.u32 2147483648, %v1303_v19 }
 0x24e   :  { %v924_v22 = vxor.u32 2147483648, %v923_v23  ;;  %v1041_v26 = vxor.u32 2147483648, %v1305_v57 }
 0x24f   :  { %v1045_v45 = vsel %vm1043_vm7, %v1044_v1, %v1305_v57 }
 0x250   :  { %v925_v32 = vsel %vm842_vm4, %v924_v22, %v923_v23  ;;  %v1042_v28 = vsel %vm1040_vm6, %v1303_v19, %v1041_v26 }
 0x251   :  { %v928_v29 = vsel %vm841_vm5, %v1810_v9, %v925_v32  ;;  %v1046_v14 = vsel %vm1039_vm8, %v1042_v28, %v1045_v45 }
 0x252   :  { %1306 = vcosq.f32 %v928_v29  ;;  %v1047_v37 = vsel %vm1036_vm12, nan, %v1046_v14 }
 0x253   :  { %1308 = vsinq.f32 %v928_v29 }
 0x25c   :  { %v1307_v61 = vpop.eup %1306 }
 0x25d   :  { %v1309_v4 = vpop.eup %1308  ;;  %v940_v3 = vxor.u32 2147483648, %v1307_v61 }
 0x25e   :  { %v937_v56 = vxor.u32 2147483648, %v1309_v4 }
 0x25f   :  { %v941_v48 = vsel %vm939_vm9, %v940_v3, %v1309_v4 }
 0x260   :  { %v938_v58 = vsel %vm936_vm10, %v1307_v61, %v937_v56 }
 0x261   :  { %v942_v63 = vsel %vm935_vm13, %v938_v58, %v941_v48 }
 0x262   :  { %v943_v34 = vsel %vm932_vm14, nan, %v942_v63 }
 0x263   :  { %v1231_v62 = vpack.c.bf16 %v1047_v37, %v943_v34 }
 0x265   :  { %1232 = vmatpush3.bf16.msra.mxu1 %v1231_v62 }
 0x268   :  { %1217 = vmatmul.mubr.msk.f32.vlgmr.msra.gmra.mrb[0].mxu1 %vm534_vm11, %v1048_v20 }
 0x33b   :  { %v1124_v38 = vpop.f32.mrb[0].mxu1 }
 0x33c   :  { %v1125_v7 = vadd.f32 %v1124_v38, %v1053_v55  ;;  %v1218_v16 = vpop.f32.mrb[1].mxu1 }
 0x33e   :  { %1128 = vst [vmem:[#allocation2] sm:$0xff] %v1125_v7 }
 0x33f   :  { %1321 = shalt.err (!%p1318_p4)
}
 0x340   :  { %s1322_s5 = scalar_lea.hbm %s2112_s7, 128 }
 0x341   :  { %p1323_p5 = scmp.ne.s32.totalorder %s2112_s7, %s1322_s5  ;;  %p1326_p6 = scmp.lt.u32.totalorder %s1322_s5, %s2112_s7 }
 0x343   :  { %p1328_p7 = pnand %p1326_p6, %p1323_p5 }
 0x345   :  { %1331 = shalt.err (!%p1328_p7)
}
 0x346   :  { %1138 = dma.vmem_to_hbm [thread:$0]  %s1136_s11, 128, %s2112_s7, [#allocation3]  }
 0x347   :  { %1332 = dma.done.wait [#allocation3], 128  }
 0x348   :  { %1333 = vsyncadd [#allocation3], 4294967168 }
 0x349   :  { %1142 = vsyncpa [#allocation3], 1 }

</bundles_post_ra>
